<compile_context>
chip_gen: v5e
topology: v5e:2x2
jax: 0.10.0
libtpu: 0.0.40
codegen_flags: <defaults>
</compile_context>

<pallas_src>
import functools

import jax
import jax.numpy as jnp
from jax.experimental import pallas as pl
from jax.experimental.pallas import tpu as pltpu

IN_FEATURES = 16
HIDDEN = 16
OUT_FEATURES = 5
BN_EPS = 1e-5

PACK = 8                       # logical rows packed per 128-lane vector row
LANE = PACK * IN_FEATURES      # 128
SUBLANE = 16                   # row-tile alignment (covers f32 and bf16 tiling)
DEFAULT_TILE_ROWS = 4096       # packed rows per grid step; (4096,128) f32 = 2 MiB


def _round_up(n, m):
    return ((n + m - 1) // m) * m


def _jsc_kernel(x_ref, scale_ref, shift_ref,
                w1_ref, b1_ref, w2_ref, b2_ref, w3_ref, b3_ref,
                o_ref):
    # All tiles are lane-dense (tb, 128).  Weights are 128x128 block-diagonal
    # (kron(eye(8), W)), so one full-width MXU matmul processes 8 logical rows
    # per vector row.  Compute in f32 regardless of the streamed dtype.
    x = x_ref[...].astype(jnp.float32)

    # BatchNorm1d (inference, folded to per-feature scale/shift) + ReLU
    h = jnp.maximum(x * scale_ref[...] + shift_ref[...], 0.0)

    # Linear(16,16) + ReLU  (packed as 128x128 block-diag)
    h = jnp.maximum(
        jnp.dot(h, w1_ref[...], preferred_element_type=jnp.float32) + b1_ref[...],
        0.0)

    # Linear(16,16) + ReLU
    h = jnp.maximum(
        jnp.dot(h, w2_ref[...], preferred_element_type=jnp.float32) + b2_ref[...],
        0.0)

    # Linear(16,5) + ReLU  (output features zero-padded 5 -> 16 for dense stores)
    h = jnp.maximum(
        jnp.dot(h, w3_ref[...], preferred_element_type=jnp.float32) + b3_ref[...],
        0.0)

    o_ref[...] = h.astype(o_ref.dtype)


@functools.partial(jax.jit, static_argnames=("tile_rows",))
def jsc_three_linear_layers(x, packed_params, *, tile_rows=DEFAULT_TILE_ROWS):
    """x: (B, 16) f32/bf16.  packed_params: see pack_params().  Returns (B, 5)."""
    B = x.shape[0]
    dtype = x.dtype
    itemsize = jnp.dtype(dtype).itemsize

    # Pad only to the 8-row packing granularity (NOT to a full tile).
    Bp = _round_up(B, PACK)
    if Bp != B:
        x = jnp.pad(x, ((0, Bp - B), (0, 0)))
    R = Bp // PACK
    xp = x.reshape(R, LANE)        # free row-major reshape -> lane-dense layout

    # Packed-row tile: large (amortizes per-step pipeline overhead), SUBLANE
    # aligned, and aiming for >=2 grid steps so a 2-TC chip can split the grid.
    half = _round_up(max(1, (R + 1) // 2), SUBLANE)
    tb = min(_round_up(tile_rows, SUBLANE), half)
    if tb >= R:
        tb = R                     # single block covering the whole (small) array
    grid = (pl.cdiv(R, tb),)       # ragged last block handled by masked writes

    param_bytes = (3 * LANE * LANE + 5 * LANE) * 4
    cost = pl.CostEstimate(
        flops=2 * R * LANE * LANE * 3 + 5 * R * LANE,
        transcendentals=0,
        bytes_accessed=2 * R * LANE * itemsize + param_bytes)

    # Streamed operands: tiled over the batch grid (lane-dense in and out).
    x_spec = pl.BlockSpec((tb, LANE), lambda i: (i, 0))
    out_spec = pl.BlockSpec((tb, LANE), lambda i: (i, 0))

    def const_spec(shape):
        # Full block, constant index -> VMEM-resident across all grid steps.
        return pl.BlockSpec(shape, lambda i: (0, 0))

    in_specs = [
        x_spec,
        const_spec((1, LANE)),       # bn scale  (tiled x8)
        const_spec((1, LANE)),       # bn shift
        const_spec((LANE, LANE)),    # w1 block-diag
        const_spec((1, LANE)),       # b1
        const_spec((LANE, LANE)),    # w2 block-diag
        const_spec((1, LANE)),       # b2
        const_spec((LANE, LANE)),    # w3 (5->16 zero-padded) block-diag
        const_spec((1, LANE)),       # b3 (zero-padded)
    ]

    # VMEM budget: (x tile + out tile) * 2 buffers + double-buffered params
    # + headroom.  Default tile -> ~8.5 MiB, well inside v7x's 64 MiB.
    vmem_need = 4 * tb * LANE * itemsize + 2 * param_bytes + (2 << 20)
    compiler_params = pltpu.CompilerParams(
        dimension_semantics=("parallel",),
        vmem_limit_bytes=int(min(max(vmem_need, 32 << 20), 64 << 20)))

    out_packed = pl.pallas_call(
        _jsc_kernel,
        out_shape=jax.ShapeDtypeStruct((R, LANE), dtype),
        grid=grid,
        in_specs=in_specs,
        out_specs=out_spec,
        compiler_params=compiler_params,
        cost_estimate=cost,
    )(xp,
      packed_params["bn_scale"], packed_params["bn_shift"],
      packed_params["w1"], packed_params["b1"],
      packed_params["w2"], packed_params["b2"],
      packed_params["w3"], packed_params["b3"])

    # Unpack: (R,128) -> (Bp,16) -> (B,5).  Columns 5..15 are exact zeros
    # (zero weight/bias columns fed through ReLU) and are sliced off.
    return out_packed.reshape(Bp, IN_FEATURES)[:B, :OUT_FEATURES]


def init_params(key):
    """Deterministic synthetic logical parameters (not a checkpoint load)."""
    ks = jax.random.split(key, 10)

    # BatchNorm1d(16): gamma, beta, running_mean, running_var
    gamma = 1.0 + 0.1 * jax.random.normal(ks[0], (IN_FEATURES,), jnp.float32)
    beta = 0.1 * jax.random.normal(ks[1], (IN_FEATURES,), jnp.float32)
    running_mean = 0.05 * jax.random.normal(ks[2], (IN_FEATURES,), jnp.float32)
    running_var = jax.random.uniform(ks[3], (IN_FEATURES,), jnp.float32,
                                     minval=0.5, maxval=1.5)

    # Fold BN (inference) into per-feature scale/shift, broadcastable (1,16).
    inv_std = 1.0 / jnp.sqrt(running_var + BN_EPS)
    bn_scale = (gamma * inv_std).reshape(1, IN_FEATURES)
    bn_shift = (beta - gamma * running_mean * inv_std).reshape(1, IN_FEATURES)

    def linear_init(kw, kb, fan_in, fan_out):
        # Stored as (in, out) so the kernel computes x @ W
        # (PyTorch stores (out, in) and does x @ W.T).
        bound = 1.0 / jnp.sqrt(jnp.float32(fan_in))
        w = jax.random.uniform(kw, (fan_in, fan_out), jnp.float32,
                               minval=-bound, maxval=bound)
        b = jax.random.uniform(kb, (1, fan_out), jnp.float32,
                               minval=-bound, maxval=bound)
        return w, b

    w1, b1 = linear_init(ks[4], ks[5], IN_FEATURES, HIDDEN)
    w2, b2 = linear_init(ks[6], ks[7], HIDDEN, HIDDEN)
    w3, b3 = linear_init(ks[8], ks[9], HIDDEN, OUT_FEATURES)

    return dict(bn_scale=bn_scale, bn_shift=bn_shift,
                w1=w1, b1=b1, w2=w2, b2=b2, w3=w3, b3=b3)


def pack_params(p):
    """Fold logical params into the lane-packed layout used by the kernel.

    Row-major packing (8 logical rows per 128-lane row) means a logical x @ W
    becomes packed_x @ kron(eye(8), W); per-feature vectors are tiled x8.
    """
    eye8 = jnp.eye(PACK, dtype=jnp.float32)

    def tile_vec(v):
        v = v.reshape(1, -1).astype(jnp.float32)
        if v.shape[1] < IN_FEATURES:                      # pad 5 -> 16 with zeros
            v = jnp.pad(v, ((0, 0), (0, IN_FEATURES - v.shape[1])))
        return jnp.tile(v, (1, PACK))                     # (1, 128)

    def block_diag(w):
        w = w.astype(jnp.float32)
        if w.shape[1] < IN_FEATURES:                      # pad out-features 5 -> 16
            w = jnp.pad(w, ((0, 0), (0, IN_FEATURES - w.shape[1])))
        return jnp.kron(eye8, w)                          # (128, 128)

    return dict(
        bn_scale=tile_vec(p["bn_scale"]), bn_shift=tile_vec(p["bn_shift"]),
        w1=block_diag(p["w1"]), b1=tile_vec(p["b1"]),
        w2=block_diag(p["w2"]), b2=tile_vec(p["b2"]),
        w3=block_diag(p["w3"]), b3=tile_vec(p["b3"]),
    )


def _reference(x, p):
    h = jnp.maximum(x * p["bn_scale"] + p["bn_shift"], 0.0)
    h = jnp.maximum(h @ p["w1"] + p["b1"], 0.0)
    h = jnp.maximum(h @ p["w2"] + p["b2"], 0.0)
    h = jnp.maximum(h @ p["w3"] + p["b3"], 0.0)
    return h


if __name__ == "__main__":
    key = jax.random.PRNGKey(0)
    k_x, k_x2, k_x3, k_p = jax.random.split(key, 4)
    params = init_params(k_p)
    packed = pack_params(params)

    # Small batch: single packed row, single grid step.
    B = 8
    x = jax.random.normal(k_x, (B, IN_FEATURES), jnp.float32)
    out = jax.block_until_ready(jsc_three_linear_layers(x, packed))
    ref = _reference(x, params)
    assert out.shape == (B, OUT_FEATURES)
    assert jnp.allclose(out, ref, atol=1e-4, rtol=1e-4), "mismatch vs reference (B=8)"

    # Multi-step grid + ragged tail: B=300 -> 304 padded -> 38 packed rows,
    # tile 32 packed rows, grid (2,), masked last block.
    B2 = 300
    x2 = jax.random.normal(k_x2, (B2, IN_FEATURES), jnp.float32)
    out2 = jax.block_until_ready(jsc_three_linear_layers(x2, packed))
    ref2 = _reference(x2, params)
    assert out2.shape == (B2, OUT_FEATURES)
    assert jnp.allclose(out2, ref2, atol=1e-4, rtol=1e-4), "mismatch vs reference (B=300)"

    # bf16 streaming path (half the HBM traffic; in-kernel compute stays f32).
    B3 = 256
    x3 = jax.random.normal(k_x3, (B3, IN_FEATURES), jnp.float32)
    out3 = jax.block_until_ready(
        jsc_three_linear_layers(x3.astype(jnp.bfloat16), packed))
    ref3 = _reference(x3, params)
    assert out3.shape == (B3, OUT_FEATURES) and out3.dtype == jnp.bfloat16
    assert jnp.allclose(out3.astype(jnp.float32), ref3, atol=1e-1, rtol=1e-1), \
        "mismatch vs reference (bf16 path)"

    print("KERNEL_OK")
</pallas_src>

<mosaic_0001>
module attributes {stable_mosaic.version = 11 : i64} {
  func.func @_jsc_kernel(%arg0: i32, %arg1: memref<1x128xf32, #tpu.memory_space<vmem>>, %arg2: memref<1x128xf32, #tpu.memory_space<vmem>>, %arg3: memref<1x128xf32, #tpu.memory_space<vmem>>, %arg4: memref<128x128xf32, #tpu.memory_space<vmem>>, %arg5: memref<1x128xf32, #tpu.memory_space<vmem>>, %arg6: memref<128x128xf32, #tpu.memory_space<vmem>>, %arg7: memref<1x128xf32, #tpu.memory_space<vmem>>, %arg8: memref<128x128xf32, #tpu.memory_space<vmem>>, %arg9: memref<1x128xf32, #tpu.memory_space<vmem>>, %arg10: memref<1x128xf32, #tpu.memory_space<vmem>>) attributes {dimension_semantics = [#tpu.dimension_semantics<parallel>], iteration_bounds = array<i64: 1>, scalar_prefetch = 0 : i64, scratch_operands = 0 : i64, tpu.core_type = #tpu.core_type<tc>, window_params = [{transform_indices = @transform_0, window_bounds = array<i64: 1, 128>}, {pipeline_mode = #tpu.pipeline_mode<synchronous>, transform_indices = @transform_1, window_bounds = array<i64: 1, 128>}, {pipeline_mode = #tpu.pipeline_mode<synchronous>, transform_indices = @transform_2, window_bounds = array<i64: 1, 128>}, {pipeline_mode = #tpu.pipeline_mode<synchronous>, transform_indices = @transform_3, window_bounds = array<i64: 128, 128>}, {pipeline_mode = #tpu.pipeline_mode<synchronous>, transform_indices = @transform_4, window_bounds = array<i64: 1, 128>}, {pipeline_mode = #tpu.pipeline_mode<synchronous>, transform_indices = @transform_5, window_bounds = array<i64: 128, 128>}, {pipeline_mode = #tpu.pipeline_mode<synchronous>, transform_indices = @transform_6, window_bounds = array<i64: 1, 128>}, {pipeline_mode = #tpu.pipeline_mode<synchronous>, transform_indices = @transform_7, window_bounds = array<i64: 128, 128>}, {pipeline_mode = #tpu.pipeline_mode<synchronous>, transform_indices = @transform_8, window_bounds = array<i64: 1, 128>}, {transform_indices = @transform_9, window_bounds = array<i64: 1, 128>}]} {
    %c0 = arith.constant 0 : index
    %c0_0 = arith.constant 0 : index
    %0 = vector.load %arg1[%c0, %c0_0] : memref<1x128xf32, #tpu.memory_space<vmem>>, vector<1x128xf32>
    %c0_1 = arith.constant 0 : index
    %c0_2 = arith.constant 0 : index
    %1 = vector.load %arg2[%c0_1, %c0_2] : memref<1x128xf32, #tpu.memory_space<vmem>>, vector<1x128xf32>
    %2 = arith.mulf %0, %1 : vector<1x128xf32>
    %c0_3 = arith.constant 0 : index
    %c0_4 = arith.constant 0 : index
    %3 = vector.load %arg3[%c0_3, %c0_4] : memref<1x128xf32, #tpu.memory_space<vmem>>, vector<1x128xf32>
    %4 = arith.addf %2, %3 : vector<1x128xf32>
    %cst = arith.constant 0.000000e+00 : f32
    %5 = vector.broadcast %cst : f32 to vector<1x128xf32>
    %6 = arith.maximumf %4, %5 : vector<1x128xf32>
    %c0_5 = arith.constant 0 : index
    %c0_6 = arith.constant 0 : index
    %7 = vector.load %arg4[%c0_5, %c0_6] : memref<128x128xf32, #tpu.memory_space<vmem>>, vector<128x128xf32>
    %cst_7 = arith.constant dense<0.000000e+00> : vector<1x128xf32>
    %8 = tpu.matmul %6, %7, %cst_7 {dimension_numbers = #tpu.dot_dimension_numbers<[1], [0], [0], [1], [0, 0, 1, 1], [], []>} : vector<1x128xf32>, vector<128x128xf32>, vector<1x128xf32> -> vector<1x128xf32>
    %c0_8 = arith.constant 0 : index
    %c0_9 = arith.constant 0 : index
    %9 = vector.load %arg5[%c0_8, %c0_9] : memref<1x128xf32, #tpu.memory_space<vmem>>, vector<1x128xf32>
    %10 = arith.addf %8, %9 : vector<1x128xf32>
    %cst_10 = arith.constant 0.000000e+00 : f32
    %11 = vector.broadcast %cst_10 : f32 to vector<1x128xf32>
    %12 = arith.maximumf %10, %11 : vector<1x128xf32>
    %c0_11 = arith.constant 0 : index
    %c0_12 = arith.constant 0 : index
    %13 = vector.load %arg6[%c0_11, %c0_12] : memref<128x128xf32, #tpu.memory_space<vmem>>, vector<128x128xf32>
    %cst_13 = arith.constant dense<0.000000e+00> : vector<1x128xf32>
    %14 = tpu.matmul %12, %13, %cst_13 {dimension_numbers = #tpu.dot_dimension_numbers<[1], [0], [0], [1], [0, 0, 1, 1], [], []>} : vector<1x128xf32>, vector<128x128xf32>, vector<1x128xf32> -> vector<1x128xf32>
    %c0_14 = arith.constant 0 : index
    %c0_15 = arith.constant 0 : index
    %15 = vector.load %arg7[%c0_14, %c0_15] : memref<1x128xf32, #tpu.memory_space<vmem>>, vector<1x128xf32>
    %16 = arith.addf %14, %15 : vector<1x128xf32>
    %cst_16 = arith.constant 0.000000e+00 : f32
    %17 = vector.broadcast %cst_16 : f32 to vector<1x128xf32>
    %18 = arith.maximumf %16, %17 : vector<1x128xf32>
    %c0_17 = arith.constant 0 : index
    %c0_18 = arith.constant 0 : index
    %19 = vector.load %arg8[%c0_17, %c0_18] : memref<128x128xf32, #tpu.memory_space<vmem>>, vector<128x128xf32>
    %cst_19 = arith.constant dense<0.000000e+00> : vector<1x128xf32>
    %20 = tpu.matmul %18, %19, %cst_19 {dimension_numbers = #tpu.dot_dimension_numbers<[1], [0], [0], [1], [0, 0, 1, 1], [], []>} : vector<1x128xf32>, vector<128x128xf32>, vector<1x128xf32> -> vector<1x128xf32>
    %c0_20 = arith.constant 0 : index
    %c0_21 = arith.constant 0 : index
    %21 = vector.load %arg9[%c0_20, %c0_21] : memref<1x128xf32, #tpu.memory_space<vmem>>, vector<1x128xf32>
    %22 = arith.addf %20, %21 : vector<1x128xf32>
    %cst_22 = arith.constant 0.000000e+00 : f32
    %23 = vector.broadcast %cst_22 : f32 to vector<1x128xf32>
    %24 = arith.maximumf %22, %23 : vector<1x128xf32>
    %c0_23 = arith.constant 0 : index
    %c0_24 = arith.constant 0 : index
    %25 = vector.load %arg10[%c0_23, %c0_24] : memref<1x128xf32, #tpu.memory_space<vmem>>, vector<1x128xf32>
    tpu.vector_store %arg10[%c0_23, %c0_24], %24 {strides = array<i32>} : memref<1x128xf32, #tpu.memory_space<vmem>>, vector<1x128xf32>,
    return
  }
  func.func @transform_0(%arg0: i32) -> (i32, i32) {
    %c0_i32 = arith.constant 0 : i32
    %c0_i32_0 = arith.constant 0 : i32
    return %arg0, %c0_i32 : i32, i32
  }
  func.func @transform_1(%arg0: i32) -> (i32, i32) {
    %c0_i32 = arith.constant 0 : i32
    %c0_i32_0 = arith.constant 0 : i32
    %c0_i32_1 = arith.constant 0 : i32
    return %c0_i32, %c0_i32_0 : i32, i32
  }
  func.func @transform_2(%arg0: i32) -> (i32, i32) {
    %c0_i32 = arith.constant 0 : i32
    %c0_i32_0 = arith.constant 0 : i32
    %c0_i32_1 = arith.constant 0 : i32
    return %c0_i32, %c0_i32_0 : i32, i32
  }
  func.func @transform_3(%arg0: i32) -> (i32, i32) {
    %c0_i32 = arith.constant 0 : i32
    %c0_i32_0 = arith.constant 0 : i32
    %c0_i32_1 = arith.constant 0 : i32
    return %c0_i32, %c0_i32_0 : i32, i32
  }
  func.func @transform_4(%arg0: i32) -> (i32, i32) {
    %c0_i32 = arith.constant 0 : i32
    %c0_i32_0 = arith.constant 0 : i32
    %c0_i32_1 = arith.constant 0 : i32
    return %c0_i32, %c0_i32_0 : i32, i32
  }
  func.func @transform_5(%arg0: i32) -> (i32, i32) {
    %c0_i32 = arith.constant 0 : i32
    %c0_i32_0 = arith.constant 0 : i32
    %c0_i32_1 = arith.constant 0 : i32
    return %c0_i32, %c0_i32_0 : i32, i32
  }
  func.func @transform_6(%arg0: i32) -> (i32, i32) {
    %c0_i32 = arith.constant 0 : i32
    %c0_i32_0 = arith.constant 0 : i32
    %c0_i32_1 = arith.constant 0 : i32
    return %c0_i32, %c0_i32_0 : i32, i32
  }
  func.func @transform_7(%arg0: i32) -> (i32, i32) {
    %c0_i32 = arith.constant 0 : i32
    %c0_i32_0 = arith.constant 0 : i32
    %c0_i32_1 = arith.constant 0 : i32
    return %c0_i32, %c0_i32_0 : i32, i32
  }
  func.func @transform_8(%arg0: i32) -> (i32, i32) {
    %c0_i32 = arith.constant 0 : i32
    %c0_i32_0 = arith.constant 0 : i32
    %c0_i32_1 = arith.constant 0 : i32
    return %c0_i32, %c0_i32_0 : i32, i32
  }
  func.func @transform_9(%arg0: i32) -> (i32, i32) {
    %c0_i32 = arith.constant 0 : i32
    %c0_i32_0 = arith.constant 0 : i32
    return %arg0, %c0_i32 : i32, i32
  }
}

</mosaic_0001>

<bundles_post_ra>
// kernel: jsc_three_linear_layers.1
= control target key start
LH: loop header
LB: loop body
LE: loop exit
PB: predicated region body
PF: predicated region fallthrough
CT: control target
= control target key end

     0   :  { %14 = vsyncpa [#allocation3], 0  ;;  %s372_s0 = inlined_call_operand.vmem [shape: f32[1,128], index: 0, kind: input, shape index: {}]   ;;  %s373_s1 = inlined_call_operand.vmem [shape: f32[1,128], index: 1, kind: input, shape index: {}]   ;;  %s374_s2 = inlined_call_operand.vmem [shape: f32[1,128], index: 2, kind: input, shape index: {}]   ;;  %s375_s3 = inlined_call_operand.hbm [shape: f32[128,128], index: 3, kind: input, shape index: {}]   ;;  %s376_s4 = inlined_call_operand.vmem [shape: f32[1,128], index: 4, kind: input, shape index: {}]   ;;  %s377_s5 = inlined_call_operand.hbm [shape: f32[128,128], index: 5, kind: input, shape index: {}]   ;;  %s378_s6 = inlined_call_operand.vmem [shape: f32[1,128], index: 6, kind: input, shape index: {}]   ;;  %s379_s7 = inlined_call_operand.hbm [shape: f32[128,128], index: 7, kind: input, shape index: {}]   ;;  %s380_s8 = inlined_call_operand.vmem [shape: f32[1,128], index: 8, kind: input, shape index: {}]   ;;  %s381_s9 = inlined_call_operand.vmem [shape: f32[1,128], index: 9, kind: output, shape index: {}]  }
   0x1   :  { %15 = vsyncpa [#allocation5], 0  ;;  %s41_s11 = sshll.u32 %s377_s5, 4  ;;  %s287_s12 = smov [#allocation4]   ;;  %s42_s11 = int_to_ptr.hbm [resolvable:$true] %s41_s11 }
   0x2   :  { %s43_s13 = sshll.u32 %s287_s12, 4  ;;  %s26_s16 = sshll.u32 %s375_s3, 4  ;;  %s44_s13 = int_to_ptr.vmem [resolvable:$true] %s43_s13  ;;  %s27_s16 = int_to_ptr.hbm [resolvable:$true] %s26_s16 }
   0x3   :  { %s288_s17 = smov 128   ;;  %s289_s18 = smov 8  }
   0x4   :  { %49 = dma.hbm_to_vmem [thread:$0]  %s42_s11, 2048, %s44_s13, [#allocation5], %s288_s17, %s288_s17, %s289_s18  }
   0x5   :  { %s290_s19 = smov [#allocation2]   ;;  %s56_s23 = sshll.u32 %s379_s7, 4  ;;  %s57_s23 = int_to_ptr.hbm [resolvable:$true] %s56_s23 }
   0x6   :  { %s28_s20 = sshll.u32 %s290_s19, 4  ;;  %s291_s5 = smov [#allocation6]   ;;  %s29_s20 = int_to_ptr.vmem [resolvable:$true] %s28_s20 }
   0x7   :  { %34 = dma.hbm_to_vmem [thread:$0]  %s27_s16, 2048, %s29_s20, [#allocation3], %s288_s17, %s288_s17, %s289_s18  }
   0x8   :  { %s58_s24 = sshll.u32 %s291_s5, 4  ;;  %s59_s24 = int_to_ptr.vmem [resolvable:$true] %s58_s24 }
   0x9   :  { %64 = dma.hbm_to_vmem [thread:$0]  %s57_s23, 2048, %s59_s24, [#allocation5], %s288_s17, %s288_s17, %s289_s18  }
   0xa   :  { %283 = dma.done.wait [#allocation3], 2048  }
   0xb   :  { %284 = vsyncadd [#allocation3], 4294965248 }
   0xc   :  { %285 = dma.done.wait [#allocation5], 4096  }
   0xd   :  { %286 = vsyncadd [#allocation5], 4294963200  ;;  %v100_v0 = vld [vmem:[#allocation2 + $0x78] sm:$0xff]  ;;  %v99_v1 = vld [vmem:[#allocation2 + $0x70] sm:$0xff] }
   0xe   :  { %102 = vmatpush.msra.mxu0 %v100_v0  ;;  %v98_v2 = vld [vmem:[#allocation2 + $0x68] sm:$0xff]  ;;  %v97_v3 = vld [vmem:[#allocation2 + $0x60] sm:$0xff]  ;;  %v96_v4 = vld [vmem:[#allocation2 + $0x58] sm:$0xff] }
   0xf   :  { %v138_v5 = vld [vmem:[#allocation4 + $0x78] sm:$0xff]  ;;  %v137_v6 = vld [vmem:[#allocation4 + $0x70] sm:$0xff]  ;;  %v136_v8 = vld [vmem:[#allocation4 + $0x68] sm:$0xff] }
  0x10   :  { %103 = vmatpush.msra.mxu0 %v99_v1  ;;  %140 = vmatpush.msra.mxu1 %v138_v5  ;;  %v95_v7 = vld [vmem:[#allocation2 + $0x50] sm:$0xff]  ;;  %v94_v9 = vld [vmem:[#allocation2 + $0x48] sm:$0xff]  ;;  %v135_v10 = vld [vmem:[#allocation4 + $0x60] sm:$0xff] }
  0x11   :  { %v93_v11 = vld [vmem:[#allocation2 + $0x40] sm:$0xff]  ;;  %v134_v12 = vld [vmem:[#allocation4 + $0x58] sm:$0xff]  ;;  %v133_v14 = vld [vmem:[#allocation4 + $0x50] sm:$0xff] }
  0x12   :  { %104 = vmatpush.msra.mxu0 %v98_v2  ;;  %141 = vmatpush.msra.mxu1 %v137_v6  ;;  %v92_v13 = vld [vmem:[#allocation2 + $0x38] sm:$0xff]  ;;  %v91_v15 = vld [vmem:[#allocation2 + $0x30] sm:$0xff]  ;;  %v132_v16 = vld [vmem:[#allocation4 + $0x48] sm:$0xff] }
  0x13   :  { %v79_v17 = vld [vmem:[%s372_s0] sm:$0x1]  ;;  %v90_v19 = vld [vmem:[#allocation2 + $0x28] sm:$0xff]  ;;  %v130_v23 = vld [vmem:[#allocation4 + $0x38] sm:$0xff] }
  0x14   :  { %105 = vmatpush.msra.mxu0 %v97_v3  ;;  %142 = vmatpush.msra.mxu1 %v136_v8  ;;  %v80_v18 = vld [vmem:[%s373_s1] sm:$0x1]  ;;  %v88_v25 = vld [vmem:[#allocation2 + $0x18] sm:$0xff]  ;;  %v129_v26 = vld [vmem:[#allocation4 + $0x30] sm:$0xff] }
  0x15   :  { %v131_v20 = vld [vmem:[#allocation4 + $0x40] sm:$0xff]  ;;  %v81_v22 = vmul.f32 %v80_v18, %v79_v17  ;;  %v87_v27 = vld [vmem:[#allocation2 + $0x10] sm:$0xff]  ;;  %v128_v29 = vld [vmem:[#allocation4 + $0x28] sm:$0xff] }
  0x16   :  { %106 = vmatpush.msra.mxu0 %v96_v4  ;;  %143 = vmatpush.msra.mxu1 %v135_v10  ;;  %v89_v21 = vld [vmem:[#allocation2 + $0x20] sm:$0xff]  ;;  %v86_v30 = vld [vmem:[#allocation2 + $0x8] sm:$0xff]  ;;  %v126_v34 = vld [vmem:[#allocation4 + $0x18] sm:$0xff] }
  0x17   :  { %v82_v24 = vld [vmem:[%s374_s2] sm:$0x1]  ;;  %v125_v35 = vld [vmem:[#allocation4 + $0x10] sm:$0xff]  ;;  %v124_v36 = vld [vmem:[#allocation4 + $0x8] sm:$0xff] }
  0x18   :  { %107 = vmatpush.msra.mxu0 %v95_v7  ;;  %144 = vmatpush.msra.mxu1 %v134_v12  ;;  %v83_v28 = vadd.f32 %v82_v24, %v81_v22  ;;  %v127_v31 = vld [vmem:[#allocation4 + $0x20] sm:$0xff]  ;;  %v176_v38 = vld [vmem:[#allocation6 + $0x78] sm:$0xff]  ;;  %v175_v39 = vld [vmem:[#allocation6 + $0x70] sm:$0xff] }
  0x19   :  { %v85_v32 = vld [vmem:[#allocation2] sm:$0xff]  ;;  %178 = vmatpush.msra.mxu2 %v176_v38  ;;  %v174_v40 = vld [vmem:[#allocation6 + $0x68] sm:$0xff]  ;;  %v172_v42 = vld [vmem:[#allocation6 + $0x58] sm:$0xff] }
  0x1a   :  { %108 = vmatpush.msra.mxu0 %v94_v9  ;;  %145 = vmatpush.msra.mxu1 %v133_v14  ;;  %v84_v33 = vmax.f32 %v83_v28, 0.0  ;;  %v123_v37 = vld [vmem:[#allocation4] sm:$0xff]  ;;  %v171_v43 = vld [vmem:[#allocation6 + $0x50] sm:$0xff]  ;;  %v170_v44 = vld [vmem:[#allocation6 + $0x48] sm:$0xff] }
  0x1b   :  { %179 = vmatpush.msra.mxu2 %v175_v39  ;;  %v173_v41 = vld [vmem:[#allocation6 + $0x60] sm:$0xff]  ;;  %v168_v46 = vld [vmem:[#allocation6 + $0x38] sm:$0xff]  ;;  %v167_v47 = vld [vmem:[#allocation6 + $0x30] sm:$0xff] }
  0x1c   :  { %109 = vmatpush.msra.mxu0 %v93_v11  ;;  %146 = vmatpush.msra.mxu1 %v132_v16  ;;  %v169_v45 = vld [vmem:[#allocation6 + $0x40] sm:$0xff]  ;;  %v166_v48 = vld [vmem:[#allocation6 + $0x28] sm:$0xff]  ;;  %v164_v50 = vld [vmem:[#allocation6 + $0x18] sm:$0xff] }
  0x1d   :  { %180 = vmatpush.msra.mxu2 %v174_v40  ;;  %v165_v49 = vld [vmem:[#allocation6 + $0x20] sm:$0xff]  ;;  %v163_v55 = vld [vmem:[#allocation6 + $0x10] sm:$0xff]  ;;  %v162_v56 = vld [vmem:[#allocation6 + $0x8] sm:$0xff] }
  0x1e   :  { %110 = vmatpush.msra.mxu0 %v92_v13  ;;  %147 = vmatpush.msra.mxu1 %v131_v20  ;;  %v101_v51 = vld [vmem:[%s376_s4] sm:$0x1] }
  0x1f   :  { %181 = vmatpush.msra.mxu2 %v173_v41  ;;  %v161_v57 = vld [vmem:[#allocation6] sm:$0xff] }
  0x20   :  { %111 = vmatpush.msra.mxu0 %v91_v15  ;;  %148 = vmatpush.msra.mxu1 %v130_v23  ;;  %v139_v58 = vld [vmem:[%s378_s6] sm:$0x1] }
  0x21   :  { %182 = vmatpush.msra.mxu2 %v172_v42  ;;  %v177_v62 = vld [vmem:[%s380_s8] sm:$0x1] }
  0x22   :  { %112 = vmatpush.msra.mxu0 %v90_v19  ;;  %149 = vmatpush.msra.mxu1 %v129_v26 }
  0x23   :  { %183 = vmatpush.msra.mxu2 %v171_v43 }
  0x24   :  { %113 = vmatpush.msra.mxu0 %v89_v21  ;;  %150 = vmatpush.msra.mxu1 %v128_v29 }
  0x25   :  { %184 = vmatpush.msra.mxu2 %v170_v44 }
  0x26   :  { %114 = vmatpush.msra.mxu0 %v88_v25  ;;  %151 = vmatpush.msra.mxu1 %v127_v31 }
  0x27   :  { %185 = vmatpush.msra.mxu2 %v169_v45 }
  0x28   :  { %115 = vmatpush.msra.mxu0 %v87_v27  ;;  %152 = vmatpush.msra.mxu1 %v126_v34 }
  0x29   :  { %186 = vmatpush.msra.mxu2 %v168_v46 }
  0x2a   :  { %116 = vmatpush.msra.mxu0 %v86_v30  ;;  %153 = vmatpush.msra.mxu1 %v125_v35 }
  0x2b   :  { %187 = vmatpush.msra.mxu2 %v167_v47 }
  0x2c   :  { %117 = vmatpush.msra.mxu0 %v85_v32  ;;  %154 = vmatpush.msra.mxu1 %v124_v36 }
  0x2d   :  { %118 = vmatmul.f32.vlgmr.msra.gmra.mxu0 %v84_v33  ;;  %188 = vmatpush.msra.mxu2 %v166_v48 }
  0x2e   :  { %155 = vmatpush.msra.mxu1 %v123_v37 }
  0x2f   :  { %189 = vmatpush.msra.mxu2 %v165_v49 }
  0x31   :  { %190 = vmatpush.msra.mxu2 %v164_v50 }
  0x33   :  { %191 = vmatpush.msra.mxu2 %v163_v55 }
  0x35   :  { %192 = vmatpush.msra.mxu2 %v162_v56 }
  0x37   :  { %193 = vmatpush.msra.mxu2 %v161_v57 }
  0xaa   :  { %v119_v52 = vpop.f32.mrf.mxu0 }
  0xab   :  { %v120_v53 = vadd.f32 %v119_v52, %v101_v51 }
  0xad   :  { %v122_v54 = vmax.f32 %v120_v53, 0.0 }
  0xaf   :  { %156 = vmatmul.f32.vlgmr.msra.gmra.mxu1 %v122_v54 }
 0x12c   :  { %v157_v59 = vpop.f32.mrf.mxu1 }
 0x12d   :  { %v158_v60 = vadd.f32 %v157_v59, %v139_v58 }
 0x12f   :  { %v160_v61 = vmax.f32 %v158_v60, 0.0 }
 0x131   :  { %194 = vmatmul.f32.vlgmr.msra.gmra.mxu2 %v160_v61 }
 0x1b4   :  { %v195_v63 = vpop.f32.mrf.mxu2 }
 0x1b5   :  { %v196_v0 = vadd.f32 %v195_v63, %v177_v62 }
 0x1b7   :  { %v198_v1 = vmax.f32 %v196_v0, 0.0 }
 0x1b9   :  { %199 = vst [vmem:[%s381_s9] sm:$0x1] %v198_v1 }
 0x1ba   :  { %204 = vsyncpa [#allocation3], 1 }
 0x1bb   :  { %205 = vsyncpa [#allocation5], 1 }

</bundles_post_ra>
